<compile_context>
chip_gen: v6e
topology: v6e:2x2x1
jax: 0.10.0
libtpu: 0.0.40
codegen_flags: <defaults>
</compile_context>

<pallas_src>
import functools

import jax
import jax.numpy as jnp
from jax import lax
from jax.experimental import pallas as pl
from jax.experimental.pallas import tpu as pltpu


def bert_embeddings_kernel(ids_sref,                    # scalar prefetch (SMEM): (N,) int32 word ids
                           pids_ref, tids_ref,          # (tm, 1) int32 position / token-type ids
                           wtab_hbm,                    # (V, H) word table, HBM
                           ptab_ref, ttab_ref,          # (P, H), (T, H) in VMEM
                           gamma_ref, beta_ref,         # (1, H)
                           out_ref,                     # (tm, H)
                           wrows, wsem,                 # scratch: (2*chunk, H) VMEM, DMA sem (2,)
                           *, eps, chunk, unroll):
    tm, H = out_ref.shape
    vocab = wtab_hbm.shape[0]
    max_pos = ptab_ref.shape[0]
    n_type = ttab_ref.shape[0]
    n_chunks = tm // chunk
    tile_base = pl.program_id(0) * tm

    # ---- manual word-row gather: issue / aggregate-wait helpers --------------
    def issue_chunk(c, slot):            # c, slot are static Python ints
        row0 = slot * chunk

        def issue_row(t, carry):
            wid = ids_sref[tile_base + c * chunk + t]
            wid = jnp.minimum(jnp.maximum(wid, 0), vocab - 1)   # DMA-safety clamp
            pltpu.make_async_copy(
                wtab_hbm.at[pl.ds(wid, 1), :],
                wrows.at[pl.ds(row0 + t, 1), :],
                wsem.at[slot]).start()
            return carry

        lax.fori_loop(0, chunk, issue_row, 0, unroll=unroll)

    def wait_chunk(slot):
        # All `chunk` row copies signal wsem[slot] with H-row byte counts; a
        # single descriptor covering the whole (chunk, H) slab consumes them.
        pltpu.make_async_copy(
            wtab_hbm.at[pl.ds(0, chunk), :],
            wrows.at[pl.ds(slot * chunk, chunk), :],
            wsem.at[slot]).wait()

    # ---- hoisted small loads --------------------------------------------------
    gamma = gamma_ref[...].astype(jnp.float32)          # (1, H)
    beta = beta_ref[...].astype(jnp.float32)            # (1, H)
    ttab = ttab_ref[...].astype(jnp.float32)            # (T, H)
    ptab = ptab_ref[...].astype(jnp.float32)            # (P, H)

    # ---- in-tile pipelined gather + compute -----------------------------------
    issue_chunk(0, 0)                                   # prime the pipeline

    for c in range(n_chunks):                           # static, small (<= 8)
        slot = c % 2
        if c + 1 < n_chunks:                            # overlap next gather w/ this compute
            issue_chunk(c + 1, 1 - slot)
        wait_chunk(slot)

        r0 = c * chunk
        w = wrows[pl.ds(slot * chunk, chunk), :].astype(jnp.float32)   # (chunk, H)

        # Position embedding: one-hot (chunk, P) @ (P, H) on the (otherwise idle) MXU.
        pids = pids_ref[pl.ds(r0, chunk), :]                           # (chunk, 1)
        pos_iota = lax.broadcasted_iota(jnp.int32, (chunk, max_pos), 1)
        onehot = jnp.where(pos_iota == pids, 1.0, 0.0).astype(jnp.float32)
        p = jnp.dot(onehot, ptab, preferred_element_type=jnp.float32)  # (chunk, H)

        # Token-type embedding: single VPU select for the 2-row table.
        tids = tids_ref[pl.ds(r0, chunk), :]                           # (chunk, 1)
        if n_type == 2:
            tt = jnp.where(tids == 0, ttab[0:1, :], ttab[1:2, :])
        else:
            tt = jnp.where(tids == 0, ttab[0:1, :], 0.0)
            for t in range(1, n_type):
                tt = tt + jnp.where(tids == t, ttab[t:t + 1, :], 0.0)

        x = w + p + tt

        # BertLayerNorm: biased variance, eps inside rsqrt, f32 accumulation.
        u = jnp.mean(x, axis=-1, keepdims=True)
        xc = x - u
        s = jnp.mean(xc * xc, axis=-1, keepdims=True)
        y = xc * lax.rsqrt(s + eps)
        y = y * gamma + beta

        # nn.Dropout: identity at inference.
        out_ref[pl.ds(r0, chunk), :] = y.astype(out_ref.dtype)


def bert_embeddings(input_ids, position_ids, token_type_ids,
                    word_emb, pos_emb, type_emb, gamma, beta,
                    *, eps=1e-12, token_block=512, chunk_block=64,
                    out_dtype=jnp.float32, issue_unroll=8):
    B, S = input_ids.shape
    V, H = word_emb.shape
    P = pos_emb.shape[0]
    T = type_emb.shape[0]
    N = B * S

    # Token tile: largest divisor of N <= token_block that is a multiple of 8.
    tm = max(8, min(token_block, N))
    while tm > 8 and N % tm != 0:
        tm //= 2
    # Keep >= 2 grid steps when possible so both v7x TensorCores get work.
    if N // tm < 2 and tm % 16 == 0:
        tm //= 2
    assert N % tm == 0 and tm % 8 == 0, "B*S must be a multiple of 8"

    # Chunk size for the in-tile gather/compute pipeline.
    chunk = max(8, min(chunk_block, tm))
    while chunk > 8 and tm % chunk != 0:
        chunk //= 2
    assert tm % chunk == 0 and chunk % 8 == 0
    unroll = issue_unroll if chunk % issue_unroll == 0 else 1

    ids_flat = input_ids.reshape(N).astype(jnp.int32)        # scalar prefetch -> SMEM
    pids_col = position_ids.reshape(N, 1).astype(jnp.int32)
    tids_col = token_type_ids.reshape(N, 1).astype(jnp.int32)
    gamma2 = gamma.reshape(1, H)
    beta2 = beta.reshape(1, H)

    grid_spec = pltpu.PrefetchScalarGridSpec(
        num_scalar_prefetch=1,
        grid=(N // tm,),
        in_specs=[
            pl.BlockSpec((tm, 1), lambda i, ids: (i, 0)),     # position ids
            pl.BlockSpec((tm, 1), lambda i, ids: (i, 0)),     # token-type ids
            pl.BlockSpec(memory_space=pl.ANY),                # word table (HBM, manual gather)
            pl.BlockSpec((P, H), lambda i, ids: (0, 0)),      # position table (VMEM-resident)
            pl.BlockSpec((T, H), lambda i, ids: (0, 0)),      # token-type table
            pl.BlockSpec((1, H), lambda i, ids: (0, 0)),      # gamma
            pl.BlockSpec((1, H), lambda i, ids: (0, 0)),      # beta
        ],
        out_specs=pl.BlockSpec((tm, H), lambda i, ids: (i, 0)),
        scratch_shapes=[
            pltpu.VMEM((2 * chunk, H), word_emb.dtype),       # double-buffered word rows
            pltpu.SemaphoreType.DMA((2,)),                    # one shared sem per buffer
        ],
    )

    out = pl.pallas_call(
        functools.partial(bert_embeddings_kernel, eps=eps, chunk=chunk, unroll=unroll),
        out_shape=jax.ShapeDtypeStruct((N, H), out_dtype),
        grid_spec=grid_spec,
        compiler_params=pltpu.CompilerParams(
            dimension_semantics=("parallel",)),
    )(ids_flat, pids_col, tids_col, word_emb, pos_emb, type_emb, gamma2, beta2)

    return out.reshape(B, S, H)


def bert_embeddings_ref(input_ids, position_ids, token_type_ids,
                        word_emb, pos_emb, type_emb, gamma, beta, eps=1e-12):
    x = (word_emb[input_ids] + pos_emb[position_ids]
         + type_emb[token_type_ids]).astype(jnp.float32)
    u = jnp.mean(x, axis=-1, keepdims=True)
    s = jnp.mean((x - u) ** 2, axis=-1, keepdims=True)
    xhat = (x - u) / jnp.sqrt(s + eps)
    return gamma * xhat + beta


if __name__ == "__main__":
    # Small BERT-like config (hidden kept lane-dense: multiple of 128).
    VOCAB = 100
    HIDDEN = 128
    MAX_POS = 64
    TYPE_VOCAB = 2
    B, S = 2, 8

    key = jax.random.PRNGKey(0)
    k_w, k_p, k_t, k_g, k_b, k_ids, k_tt = jax.random.split(key, 7)

    word_emb = 0.02 * jax.random.normal(k_w, (VOCAB, HIDDEN), jnp.float32)
    word_emb = word_emb.at[0].set(0.0)  # nn.Embedding(padding_idx=0): row 0 is zero
    pos_emb = 0.02 * jax.random.normal(k_p, (MAX_POS, HIDDEN), jnp.float32)
    type_emb = 0.02 * jax.random.normal(k_t, (TYPE_VOCAB, HIDDEN), jnp.float32)
    gamma = 1.0 + 0.1 * jax.random.normal(k_g, (HIDDEN,), jnp.float32)
    beta = 0.1 * jax.random.normal(k_b, (HIDDEN,), jnp.float32)

    input_ids = jax.random.randint(k_ids, (B, S), 0, VOCAB, dtype=jnp.int32)
    # Default position_ids / token_type_ids per the PyTorch forward.
    position_ids = jnp.broadcast_to(jnp.arange(S, dtype=jnp.int32)[None, :], (B, S))
    token_type_ids = jax.random.randint(k_tt, (B, S), 0, TYPE_VOCAB, dtype=jnp.int32)

    out = bert_embeddings(input_ids, position_ids, token_type_ids,
                          word_emb, pos_emb, type_emb, gamma, beta)
    out = jax.block_until_ready(out)

    ref = bert_embeddings_ref(input_ids, position_ids, token_type_ids,
                              word_emb, pos_emb, type_emb, gamma, beta)
    assert out.shape == (B, S, HIDDEN)
    assert jnp.allclose(out, ref, atol=1e-5, rtol=1e-5), "mismatch vs JAX reference"

    print("KERNEL_OK")
</pallas_src>

<mosaic_0001>
module attributes {stable_mosaic.version = 11 : i64} {
  func.func @bert_embeddings_kernel(%arg0: i32, %arg1: memref<16xi32, #tpu.memory_space<smem>>, %arg2: memref<8x1xi32, #tpu.memory_space<vmem>>, %arg3: memref<8x1xi32, #tpu.memory_space<vmem>>, %arg4: memref<100x128xf32, #tpu.memory_space<any>>, %arg5: memref<64x128xf32, #tpu.memory_space<vmem>>, %arg6: memref<2x128xf32, #tpu.memory_space<vmem>>, %arg7: memref<1x128xf32, #tpu.memory_space<vmem>>, %arg8: memref<1x128xf32, #tpu.memory_space<vmem>>, %arg9: memref<8x128xf32, #tpu.memory_space<vmem>>, %arg10: memref<16x128xf32, #tpu.memory_space<vmem>>, %arg11: memref<2x!tpu.dma_semaphore, #tpu.memory_space<semaphore_mem>>) attributes {dimension_semantics = [#tpu.dimension_semantics<parallel>], iteration_bounds = array<i64: 2>, scalar_prefetch = 1 : i64, scratch_operands = 2 : i64, tpu.core_type = #tpu.core_type<tc>, window_params = [{transform_indices = @transform_0, window_bounds = array<i64: 8, 1>}, {transform_indices = @transform_1, window_bounds = array<i64: 8, 1>}, {}, {pipeline_mode = #tpu.pipeline_mode<synchronous>, transform_indices = @transform_3, window_bounds = array<i64: 64, 128>}, {pipeline_mode = #tpu.pipeline_mode<synchronous>, transform_indices = @transform_4, window_bounds = array<i64: 2, 128>}, {pipeline_mode = #tpu.pipeline_mode<synchronous>, transform_indices = @transform_5, window_bounds = array<i64: 1, 128>}, {pipeline_mode = #tpu.pipeline_mode<synchronous>, transform_indices = @transform_6, window_bounds = array<i64: 1, 128>}, {transform_indices = @transform_7, window_bounds = array<i64: 8, 128>}]} {
    %c8_i32 = arith.constant 8 : i32
    %0 = arith.muli %arg0, %c8_i32 : i32
    %c0 = arith.constant 0 : index
    %c0_0 = arith.constant 0 : index
    %1 = vector.load %arg7[%c0, %c0_0] : memref<1x128xf32, #tpu.memory_space<vmem>>, vector<1x128xf32>
    %c0_1 = arith.constant 0 : index
    %c0_2 = arith.constant 0 : index
    %2 = vector.load %arg8[%c0_1, %c0_2] : memref<1x128xf32, #tpu.memory_space<vmem>>, vector<1x128xf32>
    %c0_3 = arith.constant 0 : index
    %c0_4 = arith.constant 0 : index
    %3 = vector.load %arg6[%c0_3, %c0_4] : memref<2x128xf32, #tpu.memory_space<vmem>>, vector<2x128xf32>
    %c0_5 = arith.constant 0 : index
    %c0_6 = arith.constant 0 : index
    %4 = vector.load %arg5[%c0_5, %c0_6] : memref<64x128xf32, #tpu.memory_space<vmem>>, vector<64x128xf32>
    %c0_i32 = arith.constant 0 : i32
    %c0_i32_7 = arith.constant 0 : i32
    %5 = arith.addi %0, %c0_i32_7 : i32
    %6 = arith.addi %5, %c0_i32 : i32
    %7 = arith.index_cast %6 : i32 to index
    %8 = memref.load %arg1[%7] : memref<16xi32, #tpu.memory_space<smem>>
    %c0_i32_8 = arith.constant 0 : i32
    %9 = arith.maxsi %8, %c0_i32_8 : i32
    %c99_i32 = arith.constant 99 : i32
    %10 = arith.minsi %9, %c99_i32 : i32
    %c0_i32_9 = arith.constant 0 : i32
    %11 = arith.addi %c0_i32_9, %c0_i32 : i32
    %c0_i32_10 = arith.constant 0 : i32
    %c0_i32_11 = arith.constant 0 : i32
    %12 = tpu.memref_slice %arg4[%10, %c0_i32_11] : memref<100x128xf32, #tpu.memory_space<any>> -> memref<1x128xf32, #tpu.memory_space<any>>
    %c0_i32_12 = arith.constant 0 : i32
    %13 = tpu.memref_slice %arg10[%11, %c0_i32_12] : memref<16x128xf32, #tpu.memory_space<vmem>> -> memref<1x128xf32, #tpu.memory_space<vmem>>
    %14 = tpu.memref_slice %arg11[%c0_i32_10] : memref<2x!tpu.dma_semaphore, #tpu.memory_space<semaphore_mem>> -> memref<1x!tpu.dma_semaphore, #tpu.memory_space<semaphore_mem>>
    %15 = tpu.memref_squeeze %14 : memref<1x!tpu.dma_semaphore, #tpu.memory_space<semaphore_mem>> -> memref<!tpu.dma_semaphore, #tpu.memory_space<semaphore_mem>>
    tpu.enqueue_dma source(%12 : memref<1x128xf32, #tpu.memory_space<any>>) target(%13 : memref<1x128xf32, #tpu.memory_space<vmem>>) target_semaphore(%15 : memref<!tpu.dma_semaphore, #tpu.memory_space<semaphore_mem>>)
    %c1_i32 = arith.constant 1 : i32
    %c0_i32_13 = arith.constant 0 : i32
    %16 = arith.addi %0, %c0_i32_13 : i32
    %17 = arith.addi %16, %c1_i32 : i32
    %18 = arith.index_cast %17 : i32 to index
    %19 = memref.load %arg1[%18] : memref<16xi32, #tpu.memory_space<smem>>
    %c0_i32_14 = arith.constant 0 : i32
    %20 = arith.maxsi %19, %c0_i32_14 : i32
    %c99_i32_15 = arith.constant 99 : i32
    %21 = arith.minsi %20, %c99_i32_15 : i32
    %c0_i32_16 = arith.constant 0 : i32
    %22 = arith.addi %c0_i32_16, %c1_i32 : i32
    %c0_i32_17 = arith.constant 0 : i32
    %c0_i32_18 = arith.constant 0 : i32
    %23 = tpu.memref_slice %arg4[%21, %c0_i32_18] : memref<100x128xf32, #tpu.memory_space<any>> -> memref<1x128xf32, #tpu.memory_space<any>>
    %c0_i32_19 = arith.constant 0 : i32
    %24 = tpu.memref_slice %arg10[%22, %c0_i32_19] : memref<16x128xf32, #tpu.memory_space<vmem>> -> memref<1x128xf32, #tpu.memory_space<vmem>>
    %25 = tpu.memref_slice %arg11[%c0_i32_17] : memref<2x!tpu.dma_semaphore, #tpu.memory_space<semaphore_mem>> -> memref<1x!tpu.dma_semaphore, #tpu.memory_space<semaphore_mem>>
    %26 = tpu.memref_squeeze %25 : memref<1x!tpu.dma_semaphore, #tpu.memory_space<semaphore_mem>> -> memref<!tpu.dma_semaphore, #tpu.memory_space<semaphore_mem>>
    tpu.enqueue_dma source(%23 : memref<1x128xf32, #tpu.memory_space<any>>) target(%24 : memref<1x128xf32, #tpu.memory_space<vmem>>) target_semaphore(%26 : memref<!tpu.dma_semaphore, #tpu.memory_space<semaphore_mem>>)
    %c2_i32 = arith.constant 2 : i32
    %c0_i32_20 = arith.constant 0 : i32
    %27 = arith.addi %0, %c0_i32_20 : i32
    %28 = arith.addi %27, %c2_i32 : i32
    %29 = arith.index_cast %28 : i32 to index
    %30 = memref.load %arg1[%29] : memref<16xi32, #tpu.memory_space<smem>>
    %c0_i32_21 = arith.constant 0 : i32
    %31 = arith.maxsi %30, %c0_i32_21 : i32
    %c99_i32_22 = arith.constant 99 : i32
    %32 = arith.minsi %31, %c99_i32_22 : i32
    %c0_i32_23 = arith.constant 0 : i32
    %33 = arith.addi %c0_i32_23, %c2_i32 : i32
    %c0_i32_24 = arith.constant 0 : i32
    %c0_i32_25 = arith.constant 0 : i32
    %34 = tpu.memref_slice %arg4[%32, %c0_i32_25] : memref<100x128xf32, #tpu.memory_space<any>> -> memref<1x128xf32, #tpu.memory_space<any>>
    %c0_i32_26 = arith.constant 0 : i32
    %35 = tpu.memref_slice %arg10[%33, %c0_i32_26] : memref<16x128xf32, #tpu.memory_space<vmem>> -> memref<1x128xf32, #tpu.memory_space<vmem>>
    %36 = tpu.memref_slice %arg11[%c0_i32_24] : memref<2x!tpu.dma_semaphore, #tpu.memory_space<semaphore_mem>> -> memref<1x!tpu.dma_semaphore, #tpu.memory_space<semaphore_mem>>
    %37 = tpu.memref_squeeze %36 : memref<1x!tpu.dma_semaphore, #tpu.memory_space<semaphore_mem>> -> memref<!tpu.dma_semaphore, #tpu.memory_space<semaphore_mem>>
    tpu.enqueue_dma source(%34 : memref<1x128xf32, #tpu.memory_space<any>>) target(%35 : memref<1x128xf32, #tpu.memory_space<vmem>>) target_semaphore(%37 : memref<!tpu.dma_semaphore, #tpu.memory_space<semaphore_mem>>)
    %c3_i32 = arith.constant 3 : i32
    %c0_i32_27 = arith.constant 0 : i32
    %38 = arith.addi %0, %c0_i32_27 : i32
    %39 = arith.addi %38, %c3_i32 : i32
    %40 = arith.index_cast %39 : i32 to index
    %41 = memref.load %arg1[%40] : memref<16xi32, #tpu.memory_space<smem>>
    %c0_i32_28 = arith.constant 0 : i32
    %42 = arith.maxsi %41, %c0_i32_28 : i32
    %c99_i32_29 = arith.constant 99 : i32
    %43 = arith.minsi %42, %c99_i32_29 : i32
    %c0_i32_30 = arith.constant 0 : i32
    %44 = arith.addi %c0_i32_30, %c3_i32 : i32
    %c0_i32_31 = arith.constant 0 : i32
    %c0_i32_32 = arith.constant 0 : i32
    %45 = tpu.memref_slice %arg4[%43, %c0_i32_32] : memref<100x128xf32, #tpu.memory_space<any>> -> memref<1x128xf32, #tpu.memory_space<any>>
    %c0_i32_33 = arith.constant 0 : i32
    %46 = tpu.memref_slice %arg10[%44, %c0_i32_33] : memref<16x128xf32, #tpu.memory_space<vmem>> -> memref<1x128xf32, #tpu.memory_space<vmem>>
    %47 = tpu.memref_slice %arg11[%c0_i32_31] : memref<2x!tpu.dma_semaphore, #tpu.memory_space<semaphore_mem>> -> memref<1x!tpu.dma_semaphore, #tpu.memory_space<semaphore_mem>>
    %48 = tpu.memref_squeeze %47 : memref<1x!tpu.dma_semaphore, #tpu.memory_space<semaphore_mem>> -> memref<!tpu.dma_semaphore, #tpu.memory_space<semaphore_mem>>
    tpu.enqueue_dma source(%45 : memref<1x128xf32, #tpu.memory_space<any>>) target(%46 : memref<1x128xf32, #tpu.memory_space<vmem>>) target_semaphore(%48 : memref<!tpu.dma_semaphore, #tpu.memory_space<semaphore_mem>>)
    %c4_i32 = arith.constant 4 : i32
    %c0_i32_34 = arith.constant 0 : i32
    %49 = arith.addi %0, %c0_i32_34 : i32
    %50 = arith.addi %49, %c4_i32 : i32
    %51 = arith.index_cast %50 : i32 to index
    %52 = memref.load %arg1[%51] : memref<16xi32, #tpu.memory_space<smem>>
    %c0_i32_35 = arith.constant 0 : i32
    %53 = arith.maxsi %52, %c0_i32_35 : i32
    %c99_i32_36 = arith.constant 99 : i32
    %54 = arith.minsi %53, %c99_i32_36 : i32
    %c0_i32_37 = arith.constant 0 : i32
    %55 = arith.addi %c0_i32_37, %c4_i32 : i32
    %c0_i32_38 = arith.constant 0 : i32
    %c0_i32_39 = arith.constant 0 : i32
    %56 = tpu.memref_slice %arg4[%54, %c0_i32_39] : memref<100x128xf32, #tpu.memory_space<any>> -> memref<1x128xf32, #tpu.memory_space<any>>
    %c0_i32_40 = arith.constant 0 : i32
    %57 = tpu.memref_slice %arg10[%55, %c0_i32_40] : memref<16x128xf32, #tpu.memory_space<vmem>> -> memref<1x128xf32, #tpu.memory_space<vmem>>
    %58 = tpu.memref_slice %arg11[%c0_i32_38] : memref<2x!tpu.dma_semaphore, #tpu.memory_space<semaphore_mem>> -> memref<1x!tpu.dma_semaphore, #tpu.memory_space<semaphore_mem>>
    %59 = tpu.memref_squeeze %58 : memref<1x!tpu.dma_semaphore, #tpu.memory_space<semaphore_mem>> -> memref<!tpu.dma_semaphore, #tpu.memory_space<semaphore_mem>>
    tpu.enqueue_dma source(%56 : memref<1x128xf32, #tpu.memory_space<any>>) target(%57 : memref<1x128xf32, #tpu.memory_space<vmem>>) target_semaphore(%59 : memref<!tpu.dma_semaphore, #tpu.memory_space<semaphore_mem>>)
    %c5_i32 = arith.constant 5 : i32
    %c0_i32_41 = arith.constant 0 : i32
    %60 = arith.addi %0, %c0_i32_41 : i32
    %61 = arith.addi %60, %c5_i32 : i32
    %62 = arith.index_cast %61 : i32 to index
    %63 = memref.load %arg1[%62] : memref<16xi32, #tpu.memory_space<smem>>
    %c0_i32_42 = arith.constant 0 : i32
    %64 = arith.maxsi %63, %c0_i32_42 : i32
    %c99_i32_43 = arith.constant 99 : i32
    %65 = arith.minsi %64, %c99_i32_43 : i32
    %c0_i32_44 = arith.constant 0 : i32
    %66 = arith.addi %c0_i32_44, %c5_i32 : i32
    %c0_i32_45 = arith.constant 0 : i32
    %c0_i32_46 = arith.constant 0 : i32
    %67 = tpu.memref_slice %arg4[%65, %c0_i32_46] : memref<100x128xf32, #tpu.memory_space<any>> -> memref<1x128xf32, #tpu.memory_space<any>>
    %c0_i32_47 = arith.constant 0 : i32
    %68 = tpu.memref_slice %arg10[%66, %c0_i32_47] : memref<16x128xf32, #tpu.memory_space<vmem>> -> memref<1x128xf32, #tpu.memory_space<vmem>>
    %69 = tpu.memref_slice %arg11[%c0_i32_45] : memref<2x!tpu.dma_semaphore, #tpu.memory_space<semaphore_mem>> -> memref<1x!tpu.dma_semaphore, #tpu.memory_space<semaphore_mem>>
    %70 = tpu.memref_squeeze %69 : memref<1x!tpu.dma_semaphore, #tpu.memory_space<semaphore_mem>> -> memref<!tpu.dma_semaphore, #tpu.memory_space<semaphore_mem>>
    tpu.enqueue_dma source(%67 : memref<1x128xf32, #tpu.memory_space<any>>) target(%68 : memref<1x128xf32, #tpu.memory_space<vmem>>) target_semaphore(%70 : memref<!tpu.dma_semaphore, #tpu.memory_space<semaphore_mem>>)
    %c6_i32 = arith.constant 6 : i32
    %c0_i32_48 = arith.constant 0 : i32
    %71 = arith.addi %0, %c0_i32_48 : i32
    %72 = arith.addi %71, %c6_i32 : i32
    %73 = arith.index_cast %72 : i32 to index
    %74 = memref.load %arg1[%73] : memref<16xi32, #tpu.memory_space<smem>>
    %c0_i32_49 = arith.constant 0 : i32
    %75 = arith.maxsi %74, %c0_i32_49 : i32
    %c99_i32_50 = arith.constant 99 : i32
    %76 = arith.minsi %75, %c99_i32_50 : i32
    %c0_i32_51 = arith.constant 0 : i32
    %77 = arith.addi %c0_i32_51, %c6_i32 : i32
    %c0_i32_52 = arith.constant 0 : i32
    %c0_i32_53 = arith.constant 0 : i32
    %78 = tpu.memref_slice %arg4[%76, %c0_i32_53] : memref<100x128xf32, #tpu.memory_space<any>> -> memref<1x128xf32, #tpu.memory_space<any>>
    %c0_i32_54 = arith.constant 0 : i32
    %79 = tpu.memref_slice %arg10[%77, %c0_i32_54] : memref<16x128xf32, #tpu.memory_space<vmem>> -> memref<1x128xf32, #tpu.memory_space<vmem>>
    %80 = tpu.memref_slice %arg11[%c0_i32_52] : memref<2x!tpu.dma_semaphore, #tpu.memory_space<semaphore_mem>> -> memref<1x!tpu.dma_semaphore, #tpu.memory_space<semaphore_mem>>
    %81 = tpu.memref_squeeze %80 : memref<1x!tpu.dma_semaphore, #tpu.memory_space<semaphore_mem>> -> memref<!tpu.dma_semaphore, #tpu.memory_space<semaphore_mem>>
    tpu.enqueue_dma source(%78 : memref<1x128xf32, #tpu.memory_space<any>>) target(%79 : memref<1x128xf32, #tpu.memory_space<vmem>>) target_semaphore(%81 : memref<!tpu.dma_semaphore, #tpu.memory_space<semaphore_mem>>)
    %c7_i32 = arith.constant 7 : i32
    %c0_i32_55 = arith.constant 0 : i32
    %82 = arith.addi %0, %c0_i32_55 : i32
    %83 = arith.addi %82, %c7_i32 : i32
    %84 = arith.index_cast %83 : i32 to index
    %85 = memref.load %arg1[%84] : memref<16xi32, #tpu.memory_space<smem>>
    %c0_i32_56 = arith.constant 0 : i32
    %86 = arith.maxsi %85, %c0_i32_56 : i32
    %c99_i32_57 = arith.constant 99 : i32
    %87 = arith.minsi %86, %c99_i32_57 : i32
    %c0_i32_58 = arith.constant 0 : i32
    %88 = arith.addi %c0_i32_58, %c7_i32 : i32
    %c0_i32_59 = arith.constant 0 : i32
    %c0_i32_60 = arith.constant 0 : i32
    %89 = tpu.memref_slice %arg4[%87, %c0_i32_60] : memref<100x128xf32, #tpu.memory_space<any>> -> memref<1x128xf32, #tpu.memory_space<any>>
    %c0_i32_61 = arith.constant 0 : i32
    %90 = tpu.memref_slice %arg10[%88, %c0_i32_61] : memref<16x128xf32, #tpu.memory_space<vmem>> -> memref<1x128xf32, #tpu.memory_space<vmem>>
    %91 = tpu.memref_slice %arg11[%c0_i32_59] : memref<2x!tpu.dma_semaphore, #tpu.memory_space<semaphore_mem>> -> memref<1x!tpu.dma_semaphore, #tpu.memory_space<semaphore_mem>>
    %92 = tpu.memref_squeeze %91 : memref<1x!tpu.dma_semaphore, #tpu.memory_space<semaphore_mem>> -> memref<!tpu.dma_semaphore, #tpu.memory_space<semaphore_mem>>
    tpu.enqueue_dma source(%89 : memref<1x128xf32, #tpu.memory_space<any>>) target(%90 : memref<1x128xf32, #tpu.memory_space<vmem>>) target_semaphore(%92 : memref<!tpu.dma_semaphore, #tpu.memory_space<semaphore_mem>>)
    %c8_i32_62 = arith.constant 8 : i32
    %c0_i32_63 = arith.constant 0 : i32
    %c0_i32_64 = arith.constant 0 : i32
    %c0_i32_65 = arith.constant 0 : i32
    %93 = tpu.memref_slice %arg4[%c0_i32_64, %c0_i32_65] : memref<100x128xf32, #tpu.memory_space<any>> -> memref<8x128xf32, #tpu.memory_space<any>>
    %c0_i32_66 = arith.constant 0 : i32
    %c0_i32_67 = arith.constant 0 : i32
    %94 = tpu.memref_slice %arg10[%c0_i32_66, %c0_i32_67] : memref<16x128xf32, #tpu.memory_space<vmem>> -> memref<8x128xf32, #tpu.memory_space<vmem>>
    %95 = tpu.memref_slice %arg11[%c0_i32_63] : memref<2x!tpu.dma_semaphore, #tpu.memory_space<semaphore_mem>> -> memref<1x!tpu.dma_semaphore, #tpu.memory_space<semaphore_mem>>
    %96 = tpu.memref_squeeze %95 : memref<1x!tpu.dma_semaphore, #tpu.memory_space<semaphore_mem>> -> memref<!tpu.dma_semaphore, #tpu.memory_space<semaphore_mem>>
    tpu.wait_dma2 semaphore(%96 : memref<!tpu.dma_semaphore, #tpu.memory_space<semaphore_mem>>) src(%93 : memref<8x128xf32, #tpu.memory_space<any>>) dst(%94 : memref<8x128xf32, #tpu.memory_space<vmem>>)
    %c0_68 = arith.constant 0 : index
    %c0_69 = arith.constant 0 : index
    %97 = vector.load %arg10[%c0_68, %c0_69] : memref<16x128xf32, #tpu.memory_space<vmem>>, vector<8x128xf32>
    %c0_70 = arith.constant 0 : index
    %c0_71 = arith.constant 0 : index
    %98 = vector.load %arg2[%c0_70, %c0_71] : memref<8x1xi32, #tpu.memory_space<vmem>>, vector<8x1xi32>
    %99 = tpu.iota {dimensions = array<i32: 1>} : vector<8x64xi32>
    %100 = vector.broadcast %98 : vector<8x1xi32> to vector<8x64xi32>
    %101 = arith.cmpi eq, %99, %100 : vector<8x64xi32>
    %cst = arith.constant 1.000000e+00 : f32
    %cst_72 = arith.constant 0.000000e+00 : f32
    %102 = vector.broadcast %cst : f32 to vector<8x64xf32>
    %103 = vector.broadcast %cst_72 : f32 to vector<8x64xf32>
    %104 = arith.select %101, %102, %103 : vector<8x64xi1>, vector<8x64xf32>
    %cst_73 = arith.constant dense<0.000000e+00> : vector<8x128xf32>
    %105 = tpu.matmul %104, %4, %cst_73 {dimension_numbers = #tpu.dot_dimension_numbers<[1], [0], [0], [1], [0, 0, 1, 1], [], []>} : vector<8x64xf32>, vector<64x128xf32>, vector<8x128xf32> -> vector<8x128xf32>
    %c0_74 = arith.constant 0 : index
    %c0_75 = arith.constant 0 : index
    %106 = vector.load %arg3[%c0_74, %c0_75] : memref<8x1xi32, #tpu.memory_space<vmem>>, vector<8x1xi32>
    %c0_i32_76 = arith.constant 0 : i32
    %107 = vector.broadcast %c0_i32_76 : i32 to vector<8x1xi32>
    %108 = arith.cmpi eq, %106, %107 : vector<8x1xi32>
    %109 = vector.extract_strided_slice %3 {offsets = [0, 0], sizes = [1, 128], strides = [1, 1]} : vector<2x128xf32> to vector<1x128xf32>
    %110 = vector.extract_strided_slice %3 {offsets = [1, 0], sizes = [1, 128], strides = [1, 1]} : vector<2x128xf32> to vector<1x128xf32>
    %111 = vector.shape_cast %108 : vector<8x1xi1> to vector<8x1xi1>
    %112 = vector.broadcast %111 : vector<8x1xi1> to vector<8x128xi1>
    %113 = vector.shape_cast %109 : vector<1x128xf32> to vector<1x128xf32>
    %114 = vector.broadcast %113 : vector<1x128xf32> to vector<8x128xf32>
    %115 = vector.shape_cast %110 : vector<1x128xf32> to vector<1x128xf32>
    %116 = vector.broadcast %115 : vector<1x128xf32> to vector<8x128xf32>
    %117 = arith.select %112, %114, %116 : vector<8x128xi1>, vector<8x128xf32>
    %118 = arith.addf %97, %105 : vector<8x128xf32>
    %119 = arith.addf %118, %117 : vector<8x128xf32>
    %cst_77 = arith.constant dense<0.000000e+00> : vector<8xf32>
    %120 = vector.multi_reduction <add>, %119, %cst_77 [1] : vector<8x128xf32> to vector<8xf32>
    %121 = vector.shape_cast %120 : vector<8xf32> to vector<8x1xf32>
    %cst_78 = arith.constant 1.280000e+02 : f32
    %122 = vector.broadcast %cst_78 : f32 to vector<8x1xf32>
    %123 = arith.divf %121, %122 : vector<8x1xf32>
    %124 = vector.broadcast %123 : vector<8x1xf32> to vector<8x128xf32>
    %125 = arith.subf %119, %124 : vector<8x128xf32>
    %126 = arith.mulf %125, %125 : vector<8x128xf32>
    %cst_79 = arith.constant dense<0.000000e+00> : vector<8xf32>
    %127 = vector.multi_reduction <add>, %126, %cst_79 [1] : vector<8x128xf32> to vector<8xf32>
    %128 = vector.shape_cast %127 : vector<8xf32> to vector<8x1xf32>
    %cst_80 = arith.constant 1.280000e+02 : f32
    %129 = vector.broadcast %cst_80 : f32 to vector<8x1xf32>
    %130 = arith.divf %128, %129 : vector<8x1xf32>
    %cst_81 = arith.constant 9.99999996E-13 : f32
    %131 = vector.broadcast %cst_81 : f32 to vector<8x1xf32>
    %132 = arith.addf %130, %131 : vector<8x1xf32>
    %133 = math.rsqrt %132 : vector<8x1xf32>
    %134 = vector.broadcast %133 : vector<8x1xf32> to vector<8x128xf32>
    %135 = arith.mulf %125, %134 : vector<8x128xf32>
    %136 = vector.broadcast %1 : vector<1x128xf32> to vector<8x128xf32>
    %137 = arith.mulf %135, %136 : vector<8x128xf32>
    %138 = vector.broadcast %2 : vector<1x128xf32> to vector<8x128xf32>
    %139 = arith.addf %137, %138 : vector<8x128xf32>
    %c0_82 = arith.constant 0 : index
    %c0_83 = arith.constant 0 : index
    %140 = vector.load %arg9[%c0_82, %c0_83] : memref<8x128xf32, #tpu.memory_space<vmem>>, vector<8x128xf32>
    tpu.vector_store %arg9[%c0_82, %c0_83], %139 {strides = array<i32>} : memref<8x128xf32, #tpu.memory_space<vmem>>, vector<8x128xf32>,
    return
  }
  func.func @transform_0(%arg0: i32, %arg1: memref<16xi32, #tpu.memory_space<smem>>) -> (i32, i32) {
    %c0_i32 = arith.constant 0 : i32
    %c0_i32_0 = arith.constant 0 : i32
    return %arg0, %c0_i32 : i32, i32
  }
  func.func @transform_1(%arg0: i32, %arg1: memref<16xi32, #tpu.memory_space<smem>>) -> (i32, i32) {
    %c0_i32 = arith.constant 0 : i32
    %c0_i32_0 = arith.constant 0 : i32
    return %arg0, %c0_i32 : i32, i32
  }
  func.func @transform_3(%arg0: i32, %arg1: memref<16xi32, #tpu.memory_space<smem>>) -> (i32, i32) {
    %c0_i32 = arith.constant 0 : i32
    %c0_i32_0 = arith.constant 0 : i32
    %c0_i32_1 = arith.constant 0 : i32
    return %c0_i32, %c0_i32_0 : i32, i32
  }
  func.func @transform_4(%arg0: i32, %arg1: memref<16xi32, #tpu.memory_space<smem>>) -> (i32, i32) {
    %c0_i32 = arith.constant 0 : i32
    %c0_i32_0 = arith.constant 0 : i32
    %c0_i32_1 = arith.constant 0 : i32
    return %c0_i32, %c0_i32_0 : i32, i32
  }
  func.func @transform_5(%arg0: i32, %arg1: memref<16xi32, #tpu.memory_space<smem>>) -> (i32, i32) {
    %c0_i32 = arith.constant 0 : i32
    %c0_i32_0 = arith.constant 0 : i32
    %c0_i32_1 = arith.constant 0 : i32
    return %c0_i32, %c0_i32_0 : i32, i32
  }
  func.func @transform_6(%arg0: i32, %arg1: memref<16xi32, #tpu.memory_space<smem>>) -> (i32, i32) {
    %c0_i32 = arith.constant 0 : i32
    %c0_i32_0 = arith.constant 0 : i32
    %c0_i32_1 = arith.constant 0 : i32
    return %c0_i32, %c0_i32_0 : i32, i32
  }
  func.func @transform_7(%arg0: i32, %arg1: memref<16xi32, #tpu.memory_space<smem>>) -> (i32, i32) {
    %c0_i32 = arith.constant 0 : i32
    %c0_i32_0 = arith.constant 0 : i32
    return %arg0, %c0_i32 : i32, i32
  }
}

</mosaic_0001>

<bundles_post_ra>
// kernel: tpu_custom_call.1
= control target key start
LH: loop header
LB: loop body
LE: loop exit
PB: predicated region body
PF: predicated region fallthrough
CT: control target
= control target key end

     0   :  { %s1573_s0 = inlined_call_operand.vmem [shape: s32[16], index: 0, kind: input, shape index: {}]   ;;  %s1574_s1 = inlined_call_operand.vmem [shape: s32[16,1], index: 1, kind: input, shape index: {}]   ;;  %s1575_s2 = inlined_call_operand.vmem [shape: s32[16,1], index: 2, kind: input, shape index: {}]   ;;  %s1576_s3 = inlined_call_operand.hbm [shape: f32[100,128], index: 3, kind: input, shape index: {}]   ;;  %s1577_s4 = inlined_call_operand.hbm [shape: f32[64,128], index: 4, kind: input, shape index: {}]   ;;  %s1578_s5 = inlined_call_operand.vmem [shape: f32[2,128], index: 5, kind: input, shape index: {}]   ;;  %s1579_s6 = inlined_call_operand.vmem [shape: f32[1,128], index: 6, kind: input, shape index: {}]   ;;  %s1580_s7 = inlined_call_operand.vmem [shape: f32[1,128], index: 7, kind: input, shape index: {}]   ;;  %s1581_s8 = inlined_call_operand.hbm [shape: f32[16,128], index: 8, kind: output, shape index: {}]  }
   0x1   :  { %1587 = sst [smem:[#allocation36_spill]] %s1574_s1  ;;  %s13_s29 = sshll.u32 %s1573_s0, 4  ;;  %s14_s29 = int_to_ptr.vmem [resolvable:$true] %s13_s29 }
   0x2   :  { %1588 = sst [smem:[#allocation37_spill]] %s1575_s2  ;;  %s892_s30 = scalar_lea.vmem %s14_s29, 16 }
   0x3   :  { %1589 = sst [smem:[#allocation38_spill]] %s1577_s4  ;;  %p893_p0 = scmp.ne.s32.totalorder %s14_s29, %s892_s30 }
   0x4   :  { %1590 = sst [smem:[#allocation39_spill]] %s1578_s5  ;;  %p897_p1 = scmp.lt.s32.totalorder %s14_s29, %s14_s29 }
   0x5   :  { %1591 = sst [smem:[#allocation40_spill]] %s1579_s6  ;;  %p898_p2 = scmp.lt.s32.totalorder %s892_s30, %s892_s30 }
   0x6   :  { %1592 = sst [smem:[#allocation41_spill]] %s1580_s7 }
   0x7   :  { %p899_p3 = por %p898_p2, %p897_p1 }
   0x9   :  { %p900_p4 = pnand %p899_p3, %p893_p0 }
   0xb   :  { %903 = shalt.err (!%p900_p4)  }
   0xc   :  { %s1176_s9 = smov [#allocation5]  }
   0xd   :  { %16 = dma.vmem_to_smem %s14_s29, 16, %s1176_s9, [#allocation4] }
   0xe   :  { %1148 = dma.done.wait [#allocation4], 16 }
   0xf   :  { %1149 = vsyncadd [#allocation4], 4294967280 }
  0x10   :  { %18 = sfence }
  0x11   :  { %19 = vsyncpa [#allocation7], 0 }
  0x12   :  { %20 = vsyncpa [#allocation8], 0 }
  0x13   :  { %22 = vsyncpa [#allocation8 + $0x1], 0  ;;  %s1240_s10 = smov 0   ;;  %s1242_s11 = smov 0  }
  0x14   :  { %s1244_s0 = smov 0   ;;  %s1246_s12 = smov 0  }
  0x15 LB: > { %1593 = sst [smem:[#allocation32_spill]] %s1170_s0  ;;  %s1261_s13 = sadd.s32 4294967295, %s1174_s12   ;;  %s1174_s12 = sphi %s1246_s12, %s1609_s12   ;;  %s1170_s0 = sphi %s1244_s0, %s1611_s0   ;;  %s1166_s11 = sphi %s1242_s11, %s1613_s11   ;;  %s1162_s10 = sphi %s1240_s10, %s1612_s10  }
  0x16   : > { %s714_s14 = sadd.s32 4294967294, %s1174_s12   ;;  %s1265_s15 = sadd.s32 1, %s1174_s12  }
  0x17   : > { %1594 = sst [smem:[#allocation33_spill]] %s1265_s15  ;;  %s171_s16 = sadd.s32 1, %s1170_s0 }
  0x18   : > { %s168_s17 = ssub.s32 %s1174_s12, %s1265_s15  ;;  %p181_p5 = scmp.ne.s32.totalorder %s1170_s0, %s1166_s11 }
  0x19   : > { %p169_p6 = scmp.eq.s32.totalorder %s168_s17, 0  ;;  %p182_p7 = scmp.eq.s32.totalorder %s1261_s13, 1 }
  0x1a   : > { %p187_p8 = scmp.ne.s32.totalorder %s1166_s11, %s1162_s10  ;;  %p188_p9 = scmp.eq.s32.totalorder %s714_s14, 1 }
  0x1b   : > { %s1276_s18 = scalar_select %p169_p6, %s1170_s0, %s171_s16  }
  0x1c   : > { %p1278_p10 = por %p182_p7, %p181_p5  ;;  %p1282_p11 = por %p188_p9, %p187_p8 }
  0x1d   : > { %1595 = sst [smem:[#allocation34_spill]] %s1276_s18  ;;  %p715_p12 = scmp.ge.s32.totalorder %s1174_s12, 1 }
  0x1e   : > { %s1597_s20 = scalar_select %p1282_p11, 1, 0 }
  0x1f   : > { %p195_p13 = scmp.lt.s32.totalorder %s1174_s12, 3  ;;  %p839_p0 = scmp.eq.s32.totalorder %s1261_s13, 0 }
  0x20   : > { %1598 = sst [smem:[#allocation35_spill]] %s1597_s20  ;;  %s1177_s22 = smov [#allocation6]  }
  0x21   : > { %p1289_p1 = pnand %p715_p12, %p195_p13  ;;  %s207_s23 = sshll.u32 %s1177_s22, 4  ;;  %s208_s23 = int_to_ptr.vmem [resolvable:$true] %s207_s23 }
  0x22   : > { %s915_s24 = scalar_lea.vmem %s208_s23, 1024  ;;  %p923_p8 = scmp.lt.s32.totalorder %s208_s23, %s208_s23 }
  0x23   : > { %p831_p2 = pneg %p1289_p1  ;;  %p916_p5 = scmp.ne.s32.totalorder %s208_s23, %s915_s24 }
  0x24   : > { %p924_p9 = scmp.lt.s32.totalorder %s915_s24, %s915_s24 }
  0x25   : > { %p832_p3 = pnand %p839_p0, %p831_p2 }
  0x26   : > { %p925_p11 = por %p924_p9, %p923_p8 }
  0x27   : > { %p906_p4 = pneg %p832_p3 }
  0x29   : > { %p918_p6 = pnand %p916_p5, %p906_p4 }
  0x2b   : > { %p919_p7 = pneg %p918_p6 }
  0x2d   : > { %p926_p12 = pnand %p925_p11, %p919_p7 }
  0x2f   : > { %929 = shalt.err (!%p926_p12)
}
  0x30   : > { %s1178_s25 = smov 128   ;;  %s1179_s26 = smov 8  }
  0x31   : > { %s1600_s4 = sld [smem:[#allocation38_spill]] }
  0x33   : > { %246 = sbr.rel (%p1289_p1) target bundleno = 897 (0x381), region = 44 }
  0x37   : > { %834 = dma.hbm_to_vmem [thread:$0]  (!%p832_p3), %s1600_s4, 1024, %s208_s23, [#allocation7], %s1178_s25, %s1178_s25, %s1179_s26  }
  0x38   : > { %1151 = dma.done.wait (%p839_p0), [#allocation7], 1024  }
  0x39   : > { %1153 = vsyncadd (%p839_p0), [#allocation7], 4294966272  ;;  %s1582_s29 = sand.u32 1, %s1166_s11   ;;  %p279_p11 = scmp.lt.s32.totalorder %s1261_s13, 1  ;;  %v1345_v3 = vld [vmem:[#allocation6] sm:$0xff]  ;;  %v1347_v4 = vld [vmem:[#allocation6 + $0x8] sm:$0xff] }
  0x3a   : > { %s1310_s30 = sshll.u32 %s1582_s29, 3  ;;  %s1313_s9 = sshll.u32 %s1261_s13, 3  ;;  %v1349_v5 = vld [vmem:[#allocation6 + $0x10] sm:$0xff]  ;;  %v1351_v6 = vld [vmem:[#allocation6 + $0x18] sm:$0xff]  ;;  %v1353_v7 = vld [vmem:[#allocation6 + $0x20] sm:$0xff] }
  0x3b   : > { %s299_s14 = sld [smem:[#allocation5 + %s1313_s9]]  ;;  %s317_s17 = sadd.s32 1, %s1313_s9  ;;  %v1355_v8 = vld [vmem:[#allocation6 + $0x28] sm:$0xff]  ;;  %v1359_v9 = vld [vmem:[#allocation6 + $0x30] sm:$0xff]  ;;  %v1361_v10 = vld [vmem:[#allocation6 + $0x38] sm:$0xff] }
  0x3c   : > { %s280_s16 = scalar_select %p279_p11, %s1261_s13, 1 }
  0x3d   : > { %s1180_s22 = smov [#allocation2]   ;;  %s1601_s1 = sld [smem:[#allocation36_spill]] }
  0x3e   : > { %s721_s21 = sshll.u32 %s280_s16, 3  ;;  %s313_s23 = sshll.u32 %s1180_s22, 4  ;;  %s1343_s23 = int_to_ptr.vmem [resolvable:$true] %s313_s23 }
  0x3f   : > { %s1602_s2 = sld [smem:[#allocation37_spill]]  ;;  %s1181_s0 = smov [#allocation2 + $0x1]  }
  0x40   : > { %s1603_s6 = sld [smem:[#allocation40_spill]]  ;;  %s333_s15 = sshll.u32 %s1181_s0, 4  ;;  %s1364_s15 = int_to_ptr.vmem [resolvable:$true] %s333_s15 }
  0x41   : > { %s1604_s7 = sld [smem:[#allocation41_spill]]  ;;  %p300_p13 = scmp.gt.s32.totalorder %s299_s14, 0 }
  0x42   : > { %s1605_s5 = sld [smem:[#allocation39_spill]]  ;;  %p724_p0 = scmp.lt.s32.totalorder %s299_s14, 99 }
  0x43   : > { %s1321_s26 = scalar_lea.vmem %s1601_s1, %s721_s21  ;;  %s1357_s4 = sld [smem:[#allocation5 + %s317_s17]] }
  0x44   : > { %s1615_s14 = smov (!%p300_p13, %s299_s14), 0  ;;  %s337_s18 = sadd.s32 2, %s1313_s9 }
  0x45   : > { %s1326_s29 = scalar_lea.vmem %s1602_s2, %s721_s21  ;;  %s1617_s14 = smov (!%p724_p0, %s1615_s14), 99 }
  0x46   : > { %v1331_v0 = vld [vmem:[%s1603_s6] ss:$0 sm:$0xff]  ;;  %s1366_s21 = sld [smem:[#allocation5 + %s337_s18]]  ;;  %s729_s24 = sshll.u32 %s1617_s14, 4 }
  0x47   : > { %v1336_v1 = vld [vmem:[%s1604_s7] ss:$0 sm:$0xff]  ;;  %s305_s17 = scalar_lea.hbm %s1576_s3, %s729_s24  ;;  %s1375_s1 = scalar_lea.hbm %s1576_s3, 1664 }
  0x48   : > { %v1341_v2 = vld [vmem:[%s1605_s5] sm:$0x3]  ;;  %s930_s28 = scalar_lea.hbm %s305_s17, 16  ;;  %p933_p3 = scmp.lt.s32.totalorder %s305_s17, %s1576_s3 }
  0x49   : > { %p319_p1 = scmp.gt.s32.totalorder %s1357_s4, 0  ;;  %p931_p2 = scmp.ne.s32.totalorder %s305_s17, %s930_s28 }
  0x4a   : > { %p934_p4 = scmp.lt.s32.totalorder %s1375_s1, %s930_s28 }
  0x4c   : > { %p935_p5 = por %p934_p4, %p933_p3 }
  0x4e   : > { %p936_p6 = pnand %p935_p5, %p931_p2 }
  0x50   : > { %939 = shalt.err (!%p936_p6)  }
  0x51   : > { %s940_s14 = scalar_lea.vmem %s1343_s23, 16  ;;  %s1384_s18 = scalar_lea.vmem %s1343_s23, 256 }
  0x52   : > { %p941_p7 = scmp.ne.s32.totalorder %s1343_s23, %s940_s14  ;;  %p945_p8 = scmp.lt.s32.totalorder %s1343_s23, %s1343_s23 }
  0x53   : > { %p946_p9 = scmp.lt.s32.totalorder %s1384_s18, %s940_s14 }
  0x55   : > { %p947_p12 = por %p946_p9, %p945_p8 }
  0x57   : > { %p948_p11 = pnand %p947_p12, %p941_p7 }
  0x59   : > { %951 = shalt.err (!%p948_p11)  }
  0x5a   : > { %316 = dma.hbm_to_vmem [thread:$0]  %s305_s17, 16, %s1343_s23, [#allocation3] }
  0x5b   : > { %s320_s2 = scalar_select %p319_p1, %s1357_s4, 0 }
  0x5c   : > { %p730_p13 = scmp.lt.s32.totalorder %s1357_s4, 99  ;;  %s1182_s24 = smov [#allocation2 + $0x2]  }
  0x5d   : > { %s353_s25 = sshll.u32 %s1182_s24, 4  ;;  %p339_p0 = scmp.gt.s32.totalorder %s1366_s21, 0  ;;  %s1397_s25 = int_to_ptr.vmem [resolvable:$true] %s353_s25 }
  0x5e   : > { %p736_p2 = scmp.lt.s32.totalorder %s1366_s21, 99  ;;  %s1619_s2 = smov (!%p730_p13, %s320_s2), 99 }
  0x5f   : > { %s340_s27 = scalar_select %p339_p0, %s1366_s21, 0 }
  0x60   : > { %s735_s28 = sshll.u32 %s1619_s2, 4  ;;  %s357_s14 = sadd.s32 3, %s1313_s9 }
  0x61   : > { %s324_s0 = scalar_lea.hbm %s1576_s3, %s735_s28 }
  0x62   : > { %s952_s5 = scalar_lea.hbm %s324_s0, 16  ;;  %p955_p1 = scmp.lt.s32.totalorder %s324_s0, %s1576_s3 }
  0x63   : > { %p953_p3 = scmp.ne.s32.totalorder %s324_s0, %s952_s5  ;;  %p956_p4 = scmp.lt.s32.totalorder %s1375_s1, %s952_s5 }
  0x65   : > { %p957_p5 = por %p956_p4, %p955_p1 }
  0x67   : > { %p958_p6 = pnand %p957_p5, %p953_p3 }
  0x69   : > { %961 = shalt.err (!%p958_p6)  }
  0x6a   : > { %s962_s4 = scalar_lea.vmem %s1364_s15, 16  ;;  %p967_p8 = scmp.lt.s32.totalorder %s1364_s15, %s1343_s23 }
  0x6b   : > { %p963_p7 = scmp.ne.s32.totalorder %s1364_s15, %s962_s4  ;;  %p968_p9 = scmp.lt.s32.totalorder %s1384_s18, %s962_s4 }
  0x6d   : > { %p969_p12 = por %p968_p9, %p967_p8 }
  0x6f   : > { %p970_p11 = pnand %p969_p12, %p963_p7 }
  0x71   : > { %973 = shalt.err (!%p970_p11)  }
  0x72   : > { %336 = dma.hbm_to_vmem [thread:$0]  %s324_s0, 16, %s1364_s15, [#allocation3] }
  0x73   : > { %s1621_s27 = smov (!%p736_p2, %s340_s27), 99  ;;  %s1415_s5 = sld [smem:[#allocation5 + %s357_s14]] }
  0x74   : > { %s741_s6 = sshll.u32 %s1621_s27, 4  ;;  %s1183_s16 = smov [#allocation2 + $0x3]  }
  0x75   : > { %s344_s28 = scalar_lea.hbm %s1576_s3, %s741_s6  ;;  %s373_s22 = sshll.u32 %s1183_s16, 4  ;;  %s1431_s22 = int_to_ptr.vmem [resolvable:$true] %s373_s22 }
  0x76   : > { %s974_s17 = scalar_lea.hbm %s344_s28, 16  ;;  %p977_p0 = scmp.lt.s32.totalorder %s344_s28, %s1576_s3 }
  0x77   : > { %p975_p13 = scmp.ne.s32.totalorder %s344_s28, %s974_s17  ;;  %p978_p3 = scmp.lt.s32.totalorder %s1375_s1, %s974_s17 }
  0x79   : > { %p979_p1 = por %p978_p3, %p977_p0 }
  0x7b   : > { %p980_p4 = pnand %p979_p1, %p975_p13 }
  0x7d   : > { %983 = shalt.err (!%p980_p4)  }
  0x7e   : > { %s984_s15 = scalar_lea.vmem %s1397_s25, 16  ;;  %p989_p5 = scmp.lt.s32.totalorder %s1397_s25, %s1343_s23 }
  0x7f   : > { %p985_p2 = scmp.ne.s32.totalorder %s1397_s25, %s984_s15  ;;  %p990_p6 = scmp.lt.s32.totalorder %s1384_s18, %s984_s15 }
  0x81   : > { %p991_p7 = por %p990_p6, %p989_p5 }
  0x83   : > { %p992_p8 = pnand %p991_p7, %p985_p2 }
  0x85   : > { %995 = shalt.err (!%p992_p8)  }
  0x86   : > { %356 = dma.hbm_to_vmem [thread:$0]  %s344_s28, 16, %s1397_s25, [#allocation3] }
  0x87   : > { %s377_s7 = sadd.s32 4, %s1313_s9  ;;  %p359_p9 = scmp.gt.s32.totalorder %s1415_s5, 0 }
  0x88   : > { %s1433_s21 = sld [smem:[#allocation5 + %s377_s7]]  ;;  %p742_p12 = scmp.lt.s32.totalorder %s1415_s5, 99 }
  0x89   : > { %s1184_s27 = smov [#allocation2 + $0x4]   ;;  %s397_s14 = sadd.s32 5, %s1313_s9 }
  0x8a   : > { %s393_s0 = sshll.u32 %s1184_s27, 4  ;;  %s1623_s5 = smov (!%p359_p9, %s1415_s5), 0  ;;  %s1442_s0 = int_to_ptr.vmem [resolvable:$true] %s393_s0 }
  0x8b   : > { %s1439_s6 = sld [smem:[#allocation5 + %s397_s14]]  ;;  %s1625_s5 = smov (!%p742_p12, %s1623_s5), 99 }
  0x8c   : > { %s747_s25 = sshll.u32 %s1625_s5, 4  ;;  %s1185_s16 = smov [#allocation2 + $0x5]  }
  0x8d   : > { %s364_s28 = scalar_lea.hbm %s1576_s3, %s747_s25  ;;  %s1448_s17 = sshll.u32 %s1185_s16, 4  ;;  %s414_s17 = int_to_ptr.vmem [resolvable:$true] %s1448_s17 }
  0x8e   : > { %p379_p11 = scmp.gt.s32.totalorder %s1433_s21, 0  ;;  %p748_p13 = scmp.lt.s32.totalorder %s1433_s21, 99 }
  0x8f   : > { %s996_s4 = scalar_lea.hbm %s364_s28, 16  ;;  %p999_p3 = scmp.lt.s32.totalorder %s364_s28, %s1576_s3 }
  0x90   : > { %p997_p0 = scmp.ne.s32.totalorder %s364_s28, %s996_s4  ;;  %p1000_p1 = scmp.lt.s32.totalorder %s1375_s1, %s996_s4 }
  0x92   : > { %p1001_p4 = por %p1000_p1, %p999_p3 }
  0x94   : > { %p1002_p2 = pnand %p1001_p4, %p997_p0 }
  0x96   : > { %1005 = shalt.err (!%p1002_p2)  }
  0x97   : > { %s1006_s5 = scalar_lea.vmem %s1431_s22, 16  ;;  %p1011_p6 = scmp.lt.s32.totalorder %s1431_s22, %s1343_s23 }
  0x98   : > { %p1007_p5 = scmp.ne.s32.totalorder %s1431_s22, %s1006_s5  ;;  %p1012_p7 = scmp.lt.s32.totalorder %s1384_s18, %s1006_s5 }
  0x9a   : > { %p1013_p8 = por %p1012_p7, %p1011_p6 }
  0x9c   : > { %p1014_p9 = pnand %p1013_p8, %p1007_p5 }
  0x9e   : > { %1017 = shalt.err (!%p1014_p9)  }
  0x9f   : > { %376 = dma.hbm_to_vmem [thread:$0]  %s364_s28, 16, %s1431_s22, [#allocation3] }
  0xa0   : > { %s380_s27 = scalar_select %p379_p11, %s1433_s21, 0 }
  0xa1   : > { %p399_p12 = scmp.gt.s32.totalorder %s1439_s6, 0  ;;  %p754_p0 = scmp.lt.s32.totalorder %s1439_s6, 99 }
  0xa2   : > { %s1627_s27 = smov (!%p748_p13, %s380_s27), 99  ;;  %s417_s2 = sadd.s32 6, %s1313_s9 }
  0xa3   : > { %s400_s14 = scalar_select %p399_p12, %s1439_s6, 0 }
  0xa4   : > { %s753_s25 = sshll.u32 %s1627_s27, 4  ;;  %s1472_s15 = sld [smem:[#allocation5 + %s417_s2]] }
  0xa5   : > { %s384_s4 = scalar_lea.hbm %s1576_s3, %s753_s25 }
  0xa6   : > { %s1018_s7 = scalar_lea.hbm %s384_s4, 16  ;;  %p1021_p1 = scmp.lt.s32.totalorder %s384_s4, %s1576_s3 }
  0xa7   : > { %p1019_p3 = scmp.ne.s32.totalorder %s384_s4, %s1018_s7  ;;  %p1022_p11 = scmp.lt.s32.totalorder %s1375_s1, %s1018_s7 }
  0xa9   : > { %p1023_p4 = por %p1022_p11, %p1021_p1 }
  0xab   : > { %p1024_p2 = pnand %p1023_p4, %p1019_p3 }
  0xad   : > { %1027 = shalt.err (!%p1024_p2)  }
  0xae   : > { %s1028_s22 = scalar_lea.vmem %s1442_s0, 16  ;;  %p1033_p5 = scmp.lt.s32.totalorder %s1442_s0, %s1343_s23 }
  0xaf   : > { %p1029_p13 = scmp.ne.s32.totalorder %s1442_s0, %s1028_s22  ;;  %p1034_p6 = scmp.lt.s32.totalorder %s1384_s18, %s1028_s22 }
  0xb1   : > { %p1035_p7 = por %p1034_p6, %p1033_p5 }
  0xb3   : > { %p1036_p8 = pnand %p1035_p7, %p1029_p13 }
  0xb5   : > { %1039 = shalt.err (!%p1036_p8)  }
  0xb6   : > { %396 = dma.hbm_to_vmem [thread:$0]  %s384_s4, 16, %s1442_s0, [#allocation3] }
  0xb7   : > { %s1629_s14 = smov (!%p754_p0, %s400_s14), 99  ;;  %s437_s25 = sadd.s32 7, %s1313_s9 }
  0xb8   : > { %s759_s20 = sshll.u32 %s1629_s14, 4 }
  0xb9   : > { %s404_s27 = scalar_lea.hbm %s1576_s3, %s759_s20 }
  0xba   : > { %s1040_s2 = scalar_lea.hbm %s404_s27, 16  ;;  %p1043_p12 = scmp.lt.s32.totalorder %s404_s27, %s1576_s3 }
  0xbb   : > { %p1041_p9 = scmp.ne.s32.totalorder %s404_s27, %s1040_s2  ;;  %p1044_p3 = scmp.lt.s32.totalorder %s1375_s1, %s1040_s2 }
  0xbd   : > { %p1045_p1 = por %p1044_p3, %p1043_p12 }
  0xbf   : > { %p1046_p11 = pnand %p1045_p1, %p1041_p9 }
  0xc1   : > { %1049 = shalt.err (!%p1046_p11)  }
  0xc2   : > { %s1050_s0 = scalar_lea.vmem %s414_s17, 16  ;;  %p1055_p4 = scmp.lt.s32.totalorder %s414_s17, %s1343_s23 }
  0xc3   : > { %p1051_p0 = scmp.ne.s32.totalorder %s414_s17, %s1050_s0  ;;  %p1056_p2 = scmp.lt.s32.totalorder %s1384_s18, %s1050_s0 }
  0xc5   : > { %p1057_p13 = por %p1056_p2, %p1055_p4 }
  0xc7   : > { %p1058_p5 = pnand %p1057_p13, %p1051_p0 }
  0xc9   : > { %1061 = shalt.err (!%p1058_p5)  }
  0xca   : > { %416 = dma.hbm_to_vmem [thread:$0]  %s404_s27, 16, %s414_s17, [#allocation3] }
  0xcb   : > { %p419_p6 = scmp.gt.s32.totalorder %s1472_s15, 0  ;;  %p760_p7 = scmp.lt.s32.totalorder %s1472_s15, 99 }
  0xcc   : > { %s1186_s9 = smov [#allocation2 + $0x6]   ;;  %s438_s14 = sld [smem:[#allocation5 + %s437_s25]] }
  0xcd   : > { %s433_s6 = sshll.u32 %s1186_s9, 4  ;;  %s1631_s15 = smov (!%p419_p6, %s1472_s15), 0  ;;  %s434_s6 = int_to_ptr.vmem [resolvable:$true] %s433_s6 }
  0xce   : > { %s1633_s15 = smov (!%p760_p7, %s1631_s15), 99 }
  0xcf   : > { %s765_s4 = sshll.u32 %s1633_s15, 4 }
  0xd0   : > { %s424_s22 = scalar_lea.hbm %s1576_s3, %s765_s4 }
  0xd1   : > { %s1062_s20 = scalar_lea.hbm %s424_s22, 16  ;;  %p1065_p12 = scmp.lt.s32.totalorder %s424_s22, %s1576_s3 }
  0xd2   : > { %p439_p8 = scmp.gt.s32.totalorder %s438_s14, 0  ;;  %p1063_p9 = scmp.ne.s32.totalorder %s424_s22, %s1062_s20 }
  0xd3   : > { %p1066_p3 = scmp.lt.s32.totalorder %s1375_s1, %s1062_s20 }
  0xd5   : > { %p1067_p1 = por %p1066_p3, %p1065_p12 }
  0xd7   : > { %p1068_p11 = pnand %p1067_p1, %p1063_p9 }
  0xd9   : > { %1071 = shalt.err (!%p1068_p11)  }
  0xda   : > { %s1072_s28 = scalar_lea.vmem %s434_s6, 16  ;;  %p1077_p4 = scmp.lt.s32.totalorder %s434_s6, %s1343_s23 }
  0xdb   : > { %p1073_p0 = scmp.ne.s32.totalorder %s434_s6, %s1072_s28  ;;  %p1078_p2 = scmp.lt.s32.totalorder %s1384_s18, %s1072_s28 }
  0xdd   : > { %p1079_p13 = por %p1078_p2, %p1077_p4 }
  0xdf   : > { %p1080_p5 = pnand %p1079_p13, %p1073_p0 }
  0xe1   : > { %1083 = shalt.err (!%p1080_p5)  }
  0xe2   : > { %436 = dma.hbm_to_vmem [thread:$0]  %s424_s22, 16, %s434_s6, [#allocation3] }
  0xe3   : > { %s440_s15 = scalar_select %p439_p8, %s438_s14, 0 }
  0xe4   : > { %p766_p6 = scmp.lt.s32.totalorder %s438_s14, 99  ;;  %s1187_s27 = smov [#allocation2 + $0x7]  }
  0xe5   : > { %s453_s25 = sshll.u32 %s1187_s27, 4  ;;  %s454_s25 = int_to_ptr.vmem [resolvable:$true] %s453_s25 }
  0xe6   : > { %s1635_s15 = smov (!%p766_p6, %s440_s15), 99 }
  0xe7   : > { %s771_s2 = sshll.u32 %s1635_s15, 4 }
  0xe8   : > { %s444_s0 = scalar_lea.hbm %s1576_s3, %s771_s2 }
  0xe9   : > { %s1084_s9 = scalar_lea.hbm %s444_s0, 16  ;;  %p1087_p9 = scmp.lt.s32.totalorder %s444_s0, %s1576_s3 }
  0xea   : > { %p1085_p7 = scmp.ne.s32.totalorder %s444_s0, %s1084_s9  ;;  %p1088_p12 = scmp.lt.s32.totalorder %s1375_s1, %s1084_s9 }
  0xec   : > { %p1089_p3 = por %p1088_p12, %p1087_p9 }
  0xee   : > { %p1090_p1 = pnand %p1089_p3, %p1085_p7 }
  0xf0   : > { %1093 = shalt.err (!%p1090_p1)  }
  0xf1   : > { %s1094_s6 = scalar_lea.vmem %s454_s25, 16  ;;  %p1099_p11 = scmp.lt.s32.totalorder %s454_s25, %s1343_s23 }
  0xf2   : > { %p1095_p8 = scmp.ne.s32.totalorder %s454_s25, %s1094_s6  ;;  %p1100_p0 = scmp.lt.s32.totalorder %s1384_s18, %s1094_s6 }
  0xf4   : > { %p1101_p4 = por %p1100_p0, %p1099_p11 }
  0xf6   : > { %p1102_p2 = pnand %p1101_p4, %p1095_p8 }
  0xf8   : > { %1105 = shalt.err (!%p1102_p2)  }
  0xf9   : > { %456 = dma.hbm_to_vmem [thread:$0]  %s444_s0, 16, %s454_s25, [#allocation3] }
  0xfa   : > { %s278_s14 = scalar_lea.vmem [#allocation9], %s1310_s30 }
  0xfb   : > { %1154 = dma.done.wait [#allocation3], 128 }
  0xfc   : > { %1155 = vsyncadd [#allocation3], 4294967168  ;;  %v1188_v11 = vmov 0   ;;  %v1189_v12 = vmov 0.0   ;;  %vm1190_vm0 = vmmov 0   ;;  %v543_v13 = vld [vmem:[%s1326_s29] sm:$0xff]  ;;  %v462_v16 = vlaneseq }
  0xfd   : > { %889 = vset.pattern.permute.xlu0 %v1188_v11  ;;  %806 = vmatprep.subr.mxu0 %v1189_v12  ;;  %v461_v14 = vld [vmem:[%s1321_s26] sm:$0xff]  ;;  %vm544_vm1 = vcmp.eq.s32.totalorder %v543_v13, 0  ;;  %vm469_vm2 = vcmask 523264   ;;  %s776_s1 = sshll.u32 %s1261_s13, 7  ;;  %s602_s29 = sshll.u32 %s278_s14, 4  ;;  %s603_s29 = int_to_ptr.vmem [resolvable:$true] %s602_s29 }
  0xfe   : > { %807 = vmatpush3.msra.mxu0 %v1361_v10  ;;  %822 = vmatprep.mubr.msk.f32.mxu0 %vm1190_vm0, %v1189_v12  ;;  %v545_v15 = vsel %vm544_vm1, 1, %v1188_v11  ;;  %v463_v17 = vand.u32 127, %v462_v16  ;;  %v551_v20 = vshrl.u32 %v462_v16, 7  ;;  %v460_v26 = vld [vmem:[#allocation2] sm:$0xff]  ;;  %s600_s18 = scalar_lea.hbm %s1581_s8, %s776_s1  ;;  %s1606_s5 = sand.u32 1, %s1166_s11  }
  0xff   : > { %808 = vmatprep.subr.mxu0 %v1189_v12  ;;  %465 = vperm.xlu0 %889, %v461_v14   ;;  %s589_s22 = scalar_lea.sflag [#allocation8], %s1606_s5  ;;  %s1106_s20 = scalar_lea.vmem %s603_s29, 128 }
 0x100   : > { %809 = vmatpush3.msra.mxu0 %v1359_v9  ;;  %v552_v21 = vsub.s32 0, %v551_v20  ;;  %v556_v22 = vsub.s32 1, %v551_v20  ;;  %p1107_p13 = scmp.ne.s32.totalorder %s603_s29, %s1106_s20  ;;  %s1191_s13 = smov [#allocation9]  }
 0x101   : > { %810 = vmatprep.subr.mxu0 %v1189_v12  ;;  %s1110_s17 = sshll.u32 %s1191_s13, 4  ;;  %s1111_s17 = int_to_ptr.vmem [resolvable:$false] %s1110_s17 }
 0x102   : > { %811 = vmatpush3.msra.mxu0 %v1355_v8  ;;  %v553_v24 = vrot.slane %v1341_v2, %v552_v21  ;;  %v557_v25 = vrot.slane %v1341_v2, %v556_v22  ;;  %p1108_p5 = pnand %p1107_p13, %p1278_p10  ;;  %s1112_s21 = scalar_lea.vmem %s1111_s17, 256 }
 0x103   : > { %812 = vmatprep.subr.mxu0 %v1189_v12  ;;  %547 = vperm.xlu0 %889, %v545_v15   ;;  %p1113_p7 = scmp.lt.s32.totalorder %s603_s29, %s1111_s17  ;;  %p1114_p9 = scmp.lt.s32.totalorder %s1112_s21, %s1106_s20 }
 0x104   : > { %813 = vmatpush3.msra.mxu0 %v1353_v7  ;;  %p1109_p6 = pneg %p1108_p5 }
 0x105   : > { %814 = vmatprep.subr.mxu0 %v1189_v12  ;;  %p1115_p12 = por %p1114_p9, %p1113_p7 }
 0x106   : > { %815 = vmatpush3.msra.mxu0 %v1351_v6 }
 0x107   : > { %816 = vmatprep.subr.mxu0 %v1189_v12  ;;  %p1116_p3 = pnand %p1115_p12, %p1109_p6 }
 0x108   : > { %817 = vmatpush3.msra.mxu0 %v1349_v5 }
 0x109   : > { %818 = vmatprep.subr.mxu0 %v1189_v12 }
 0x10a   : > { %819 = vmatpush3.msra.mxu0 %v1347_v4 }
 0x10b   : > { %820 = vmatprep.subr.mxu0 %v1189_v12 }
 0x10c   : > { %821 = vmatpush3.msra.mxu0 %v1345_v3 }
 0x17a   : > { %v466_v18 = vpop.permute.xlu0 %465 }
 0x17b   : > { %vm467_vm3 = vcmp.eq.s32.totalorder %v463_v17, %v466_v18 }
 0x17c   : > { %v468_v19 = vsel %vm467_vm3, 1.0, %v1189_v12 }
 0x17d   : > { %823 = vmatmul.mubr.msk.f32.vlgmr.msra.gmra.mxu0 %vm469_vm2, %v468_v19 }
 0x17e   : > { %v548_v23 = vpop.permute.xlu0 %547 }
 0x17f   : > { %vm549_vm4 = vcmp.eq.s32.totalorder %v548_v23, 1 }
 0x180   : > { %v558_v29 = vsel %vm549_vm4, %v553_v24, %v557_v25 }
 0x23d   : > { %v539_v27 = vpop.f32.mrf.mxu0 }
 0x23e   : > { %v559_v28 = vadd.f32 %v539_v27, %v460_v26 }
 0x23f   : > { %v824_v30 = vpop.f32.mrf.mxu0 }
 0x240   : > { %v560_v31 = vadd.f32 %v559_v28, %v558_v29 }
 0x242   : > { %561 = vadd.xlane.f32.xlu1 %v560_v31 }
 0x2cb   : > { %v562_v32 = vpop.xlane.xlu1 %561 }
 0x2cc   : > { %v564_v33 = vmul.f32 0.0078125, %v562_v32 }
 0x2ce   : > { %v565_v34 = vsub.f32 %v560_v31, %v564_v33 }
 0x2d0   : > { %v566_v35 = vmul.f32 %v565_v34, %v565_v34 }
 0x2d2   : > { %567 = vadd.xlane.f32.xlu1 %v566_v35 }
 0x35b   : > { %v568_v36 = vpop.xlane.xlu1 %567 }
 0x35c   : > { %v569_v37 = vmul.f32 0.0078125, %v568_v36 }
 0x35e   : > { %v570_v38 = vadd.f32 1e-12, %v569_v37 }
 0x360   : > { %890 = vrsqrt.f32 %v570_v38 }
 0x36d   : > { %v891_v39 = vpop.eup %890 }
 0x36e   : > { %v572_v40 = vmul.f32 %v891_v39, %v565_v34 }
 0x370   : > { %v579_v41 = vmul.f32 %v1331_v0, %v572_v40 }
 0x372   : > { %v586_v42 = vadd.f32 %v1336_v1, %v579_v41 }
 0x374   : > { %587 = vst [vmem:[%s278_s14] sm:$0xff] %v586_v42 }
 0x375   : > { %1119 = shalt.err (!%p1116_p3)
}
 0x376   : > { %s1120_s28 = scalar_lea.hbm %s600_s18, 128  ;;  %s1124_s27 = scalar_lea.hbm %s1581_s8, 256 }
 0x377   : > { %p1121_p1 = scmp.ne.s32.totalorder %s600_s18, %s1120_s28  ;;  %p1125_p0 = scmp.lt.s32.totalorder %s600_s18, %s1581_s8 }
 0x378   : > { %p1126_p4 = scmp.lt.s32.totalorder %s1124_s27, %s1120_s28 }
 0x379   : > { %p1122_p8 = pnand %p1121_p1, %p1278_p10 }
 0x37a   : > { %p1127_p2 = por %p1126_p4, %p1125_p0 }
 0x37b   : > { %p1123_p11 = pneg %p1122_p8 }
 0x37d   : > { %p1128_p13 = pnand %p1127_p2, %p1123_p11 }
 0x37f   : > { %1131 = shalt.err (!%p1128_p13)
}
 0x380   : > { %829 = dma.vmem_to_hbm [thread:$0]  (%p1278_p10), %s603_s29, 128, %s600_s18, %s589_s22  }
 0x381 PF: > { %s1607_s24 = sld [smem:[#allocation35_spill]]  ;;  %p841_p5 = scmp.ge.s32.totalorder %s1174_s12, 2 }
 0x382   : > { %s614_s16 = sand.u32 1, %s1162_s10  }
 0x383   : > { %s615_s0 = scalar_lea.sflag [#allocation8], %s614_s16 }
 0x387   : > { %p1608_p6 = scmp.ne.s32.totalorder %s1607_s24, 0 }
 0x389   : > { %p836_p7 = pnand %p841_p5, %p1608_p6 }
 0x38b   : > { %p837_p9 = pneg %p836_p7 }
 0x38d   : > { %1157 = dma.done.wait (%p837_p9), %s615_s0, 128  }
 0x38e   : > { %1159 = vsyncadd (%p837_p9), %s615_s0, 4294967168  ;;  %s1609_s12 = sld [smem:[#allocation33_spill]]  ;;  %s1612_s10 = smov %s1166_s11 }
 0x38f   : > { %s1610_s9 = sld [smem:[#allocation32_spill]] }
 0x390   : > { %s1611_s0 = sld [smem:[#allocation34_spill]] }
 0x394   : > { %p25_p12 = scmp.ge.s32.totalorder %s1609_s12, 4  }
 0x395   : > { %s1613_s11 = smov %s1610_s9 }
 0x396   :  { %27 = sbr.rel (!%p25_p12) target bundleno = 21 (0x15), region = 135 }
 0x39b   :  { %620 = vsyncpa [#allocation7], 1 }
 0x39c   :  { %622 = vsyncpa [#allocation7 + $0x1], 1 }
 0x39d   :  { %623 = vsyncpa [#allocation8], 1 }
 0x39e   :  { %625 = vsyncpa [#allocation8 + $0x1], 1 }
 0x39f   :  { %626 = vsyncmov [#allocation3] }
 0x3a2   :  { %s627_s19 = vpop.sfrf %626 }
 0x3a3   :  { %p779_p10 = scmp.ne.s32.totalorder %s627_s19, 0 }
 0x3a5   :  { %631 = shalt.err (%p779_p10)  }
 0x3a6   :  { %633 = vsyncmov [#allocation3 + $0x1] }
 0x3a9   :  { %s634_s4 = vpop.sfrf %633 }
 0x3aa   :  { %p780_p3 = scmp.ne.s32.totalorder %s634_s4, 0 }
 0x3ac   :  { %638 = shalt.err (%p780_p3)  }

</bundles_post_ra>
